<compile_context>
chip_gen: v6e
topology: v6e:2x2x1
jax: 0.10.0
libtpu: 0.0.40
codegen_flags: <defaults>
</compile_context>

<pallas_src>
import functools

import numpy as np

import jax
import jax.numpy as jnp
from jax import lax
from jax.experimental import pallas as pl
from jax.experimental.pallas import tpu as pltpu


def _phase_structure(K, s):
    """Static tap/phase structure of the stride-s transposed conv (output_padding=s-1).

    Returns:
      phase_taps: list over output phases q = ph*s + pw of dicts
                  {(dh, dw): (kh, kw)} mapping input shift -> kernel tap.
      shifts:     ordered list of the distinct (dh, dw) shifts used by any phase.
    """
    pad_lo = K - 1 - K // 2
    taps_1d = []  # per 1-D phase: list of (k, d)
    for p in range(s):
        taps_1d.append([(k, (p + k - pad_lo) // s)
                        for k in range(K) if (p + k - pad_lo) % s == 0])
    phase_taps = []
    shift_set = set()
    for ph in range(s):
        for pw in range(s):
            taps = {}
            for kh, dh in taps_1d[ph]:
                for kw, dw in taps_1d[pw]:
                    taps[(dh, dw)] = (kh, kw)
                    shift_set.add((dh, dw))
            phase_taps.append(taps)
    return phase_taps, sorted(shift_set)


def _tcb_kernel(x_ref, mask_ref, w_ref, o_ref, patch_ref, *, W, shifts, eps):
    """One batch-group: phase-decomposed transposed conv + InstanceNorm + ReLU.

    x_ref:     (NB, C_in, HW)        NB images, channels on sublanes, HW lane-dense
    mask_ref:  (NS, HW)              precomputed boundary-validity masks per shift
    w_ref:     (SS*C_out, NS*C_in)   block weight (rows by phase, cols by shift)
    o_ref:     (NB, SS, C_out, HW)   per-phase lane-dense output
    patch_ref: (NS*C_in, NB*HW)      VMEM scratch: im2col patch, images on lanes
    """
    NB, C_in, HW = x_ref.shape
    SS, C_out = o_ref.shape[1], o_ref.shape[2]

    # Per-shift validity masks loaded once; (1, HW) rows broadcast over channels.
    m_all = mask_ref[...]                                     # (NS, HW)

    # ---- 1) im2col-style patch: all NB images side by side on the lane axis. ---
    for nb in range(NB):
        xi = x_ref[nb]                                        # (C_in, HW)
        for i, (dh, dw) in enumerate(shifts):
            if dh == 0 and dw == 0:
                piece = xi
            else:
                d = dh * W + dw
                xs = pltpu.roll(xi, shift=(HW - d) % HW, axis=1)   # xs[:, l] = xi[:, l+d]
                piece = xs * m_all[i:i + 1, :]                # zero cross-boundary lanes
            patch_ref[i * C_in:(i + 1) * C_in, nb * HW:(nb + 1) * HW] = piece

    # ---- 2) all phases, all taps, all images in ONE MXU contraction (f32 acc). --
    y = jnp.dot(w_ref[...], patch_ref[...],
                preferred_element_type=jnp.float32)           # (SS*C_out, NB*HW)

    # ---- 3) InstanceNorm2d(affine=False) + ReLU, per image / per channel. ------
    # Phases summed first (VPU adds on aligned sublane slices), then ONE cross-lane
    # reduction per statistic per image (XLU).
    ysum = y[0:C_out, :]
    for q in range(1, SS):
        ysum = ysum + y[q * C_out:(q + 1) * C_out, :]
    inv = 1.0 / (SS * HW)
    for nb in range(NB):
        lo, hi = nb * HW, (nb + 1) * HW
        mean = jnp.sum(ysum[:, lo:hi], axis=-1, keepdims=True) * inv    # (C_out, 1)
        diffs = []
        ssq = None
        for q in range(SS):
            d_q = y[q * C_out:(q + 1) * C_out, lo:hi] - mean
            diffs.append(d_q)
            ssq = d_q * d_q if ssq is None else ssq + d_q * d_q         # SS summed first
        var = jnp.sum(ssq, axis=-1, keepdims=True) * inv                # (C_out, 1)
        scale = lax.rsqrt(var + eps)
        for q in range(SS):
            o_ref[nb, q, :, :] = jnp.maximum(diffs[q] * scale, 0.0).astype(o_ref.dtype)


def transp_conv_block(inputs, weight, bias=None, *, skip_connection,
                      kernel_size, kernel_stride=2, eps=1e-5,
                      images_per_step=None):
    """JAX/Pallas equivalent of TranspConvBlock.forward.

    inputs = (x_nchw, skip_list, index); weight: (C_in, C_out, K, K) in PyTorch
    ConvTranspose2d layout; bias: (C_out,) (accepted but unused -- a per-channel
    constant is exactly cancelled by InstanceNorm2d(affine=False)).
    images_per_step: images fused per grid step.  None (default) fuses the whole
    batch into one step (best on v5e/v6e); on v7x pass ceil(N/2) so the grid keeps
    >=2 "parallel" steps for megacore.
    Returns (y_nchw, skip_list, index).
    """
    del bias  # cancelled by the mean subtraction of InstanceNorm2d(affine=False)
    x, skip_list, index = inputs
    assert isinstance(index, (int, np.integer)), \
        "index must be a static Python int (list indexing / crop depend on it)"
    if skip_connection:
        index = int(index) - 1
        skip = skip_list[index]
        if x.shape[2:] != skip.shape[2:]:                       # fit_dimensions crop
            x = x[:, :, :skip.shape[2], :skip.shape[3]]
        # Skip concat done in the wrapper: one HBM input, no misaligned in-kernel
        # sublane concat/relayout.
        x = jnp.concatenate([x, skip], axis=1)

    N, C_in, H, W = x.shape
    C_out = weight.shape[1]
    K, s = kernel_size, kernel_stride
    assert weight.shape[0] == C_in and weight.shape[2] == weight.shape[3] == K
    # Phase decomposition relies on H_out == s*H, which the module's fixed
    # padding=K//2, output_padding=1 gives exactly when stride==2 and K is odd.
    assert s == 2 and K % 2 == 1, "implemented for kernel_stride=2 and odd kernel_size"

    HW = H * W
    SS = s * s
    phase_taps, shifts = _phase_structure(K, s)
    NS = len(shifts)
    cdt = x.dtype   # MXU operands keep the model dtype (bf16 stays bf16)

    # Block weight: rows grouped by output phase, columns grouped by input shift.
    # w_flip is the conv-equivalent (spatially flipped) kernel.
    # TODO(synk): at large C_in the ~44% all-zero blocks should be split into
    # per-phase dots instead of one padded contraction (MXU K-tile crossover).
    w_flip = jnp.transpose(weight[:, :, ::-1, ::-1], (2, 3, 0, 1))    # (K,K,C_in,C_out)
    zero_blk = jnp.zeros((C_out, C_in), weight.dtype)
    rows = []
    for taps in phase_taps:
        blocks = []
        for sh in shifts:
            if sh in taps:
                kh, kw = taps[sh]
                blocks.append(jnp.transpose(w_flip[kh, kw], (1, 0)))  # (C_out, C_in)
            else:
                blocks.append(zero_blk)
        rows.append(jnp.concatenate(blocks, axis=1))                  # (C_out, NS*C_in)
    w_block = jnp.concatenate(rows, axis=0).astype(cdt)               # (SS*C_out, NS*C_in)

    # Precomputed boundary-validity masks (compile-time constant, one per shift).
    rr = np.arange(HW, dtype=np.int64) // W
    cc = np.arange(HW, dtype=np.int64) % W
    mask_np = np.ones((NS, HW), np.float32)
    for i, (dh, dw) in enumerate(shifts):
        mask_np[i] = ((rr + dh >= 0) & (rr + dh < H) &
                      (cc + dw >= 0) & (cc + dw < W)).astype(np.float32)
    masks = jnp.asarray(mask_np, dtype=cdt)

    # Batch grouping: NB images fused per grid step (lane axis = NB*HW inside).
    NB = N if images_per_step is None else max(1, min(int(images_per_step), N))
    G = -(-N // NB)
    N_pad = G * NB
    x_flat = x.reshape(N, C_in, HW)
    if N_pad != N:
        x_flat = jnp.concatenate(
            [x_flat, jnp.zeros((N_pad - N, C_in, HW), cdt)], axis=0)

    kernel = functools.partial(_tcb_kernel, W=W, shifts=tuple(shifts), eps=eps)

    # TODO(synk): for realistic decoder shapes on v7x (64 MiB VMEM) add an HW
    # row-block grid axis with a two-pass InstanceNorm (accumulate sum/sumsq across
    # an "arbitrary" axis, normalize in a finalize pass); not needed at these sizes.
    y_pack = pl.pallas_call(
        kernel,
        out_shape=jax.ShapeDtypeStruct((N_pad, SS, C_out, HW), cdt),
        grid=(G,),
        in_specs=[
            pl.BlockSpec((NB, C_in, HW), lambda g: (g, 0, 0)),
            pl.BlockSpec((NS, HW), lambda g: (0, 0)),            # constant masks
            pl.BlockSpec((SS * C_out, NS * C_in), lambda g: (0, 0)),  # constant weight
        ],
        out_specs=pl.BlockSpec((NB, SS, C_out, HW), lambda g: (g, 0, 0, 0)),
        scratch_shapes=[pltpu.VMEM((NS * C_in, NB * HW), cdt)],
        compiler_params=pltpu.CompilerParams(
            dimension_semantics=("parallel",),
            vmem_limit_bytes=32 * 1024 * 1024),
    )(x_flat, masks, w_block)

    # Depth-to-space glue: (N, ph, pw, C_out, H, W) -> (N, C_out, s*H, s*W).
    # TODO(synk): at realistic sizes fuse this re-layout into the downstream
    # consumer (read the phase-packed layout via its BlockSpec) to avoid an extra
    # HBM round trip; the kernel's store stays lane-dense on purpose.
    y = y_pack[:N].reshape(N, s, s, C_out, H, W)
    y = jnp.transpose(y, (0, 3, 4, 1, 5, 2)).reshape(N, C_out, s * H, s * W)
    return y, skip_list, index


def _reference(x_nchw_cat, weight, bias, K, s, eps=1e-5):
    """Pure-JAX reference (ConvTranspose2d + InstanceNorm2d + ReLU), NCHW."""
    p, op = K // 2, 1
    pad_lo, pad_hi = K - 1 - p, K - 1 - p + op
    w_oihw = jnp.transpose(weight[:, :, ::-1, ::-1], (1, 0, 2, 3))  # (C_out, C_in, K, K)
    y = lax.conv_general_dilated(
        x_nchw_cat.astype(jnp.float32), w_oihw.astype(jnp.float32),
        window_strides=(1, 1),
        padding=[(pad_lo, pad_hi), (pad_lo, pad_hi)],
        lhs_dilation=(s, s),
        dimension_numbers=("NCHW", "OIHW", "NCHW"),
    ) + bias[None, :, None, None]
    mean = y.mean(axis=(2, 3), keepdims=True)
    var = ((y - mean) ** 2).mean(axis=(2, 3), keepdims=True)
    y = (y - mean) / jnp.sqrt(var + eps)
    return jnp.maximum(y, 0.0)


if __name__ == "__main__":
    # Module config: skip_connection=True, num_input=8 (4 from x + 4 from skip),
    # num_output=8, kernel_size=3, kernel_stride=2.
    skip_connection = True
    C_x, C_skip = 4, 4
    num_input = C_x + C_skip
    num_output = 8
    kernel_size = 3
    kernel_stride = 2

    key = jax.random.PRNGKey(0)
    kx, ks, kw, kb = jax.random.split(key, 4)
    x = jax.random.normal(kx, (2, C_x, 16, 16), jnp.float32)
    skip = jax.random.normal(ks, (2, C_skip, 16, 16), jnp.float32)
    skip_list = [skip]
    index = 1

    # PyTorch ConvTranspose2d weight layout: (C_in, C_out, K, K); bias: (C_out,)
    weight = 0.1 * jax.random.normal(
        kw, (num_input, num_output, kernel_size, kernel_size), jnp.float32)
    bias = 0.1 * jax.random.normal(kb, (num_output,), jnp.float32)

    # Pure-JAX reference of the PyTorch semantics (incl. bias, which InstanceNorm
    # cancels analytically).
    x_cat = jnp.concatenate([x, skip], axis=1)
    y_ref = _reference(x_cat, weight, bias, kernel_size, kernel_stride)

    # Config 1: full batch fusion -- one grid step (best for v5e/v6e).
    y1, skip_out, index_out = transp_conv_block(
        (x, skip_list, index), weight, bias,
        skip_connection=skip_connection,
        kernel_size=kernel_size, kernel_stride=kernel_stride)
    y1 = jax.block_until_ready(y1)
    assert y1.shape == (2, num_output, 32, 32), y1.shape
    assert index_out == 0
    assert jnp.allclose(y1, y_ref, atol=1e-3, rtol=1e-3), \
        float(jnp.max(jnp.abs(y1 - y_ref)))

    # Config 2: >=2 parallel grid steps (megacore-friendly layout for v7x).
    y2, _, _ = transp_conv_block(
        (x, skip_list, index), weight, bias,
        skip_connection=skip_connection,
        kernel_size=kernel_size, kernel_stride=kernel_stride,
        images_per_step=1)
    y2 = jax.block_until_ready(y2)
    assert jnp.allclose(y2, y_ref, atol=1e-3, rtol=1e-3), \
        float(jnp.max(jnp.abs(y2 - y_ref)))

    print("KERNEL_OK")
</pallas_src>

<mosaic_0001>
module attributes {stable_mosaic.version = 11 : i64} {
  func.func @_tcb_kernel(%arg0: i32, %arg1: memref<2x8x256xf32, #tpu.memory_space<vmem>>, %arg2: memref<4x256xf32, #tpu.memory_space<vmem>>, %arg3: memref<32x32xf32, #tpu.memory_space<vmem>>, %arg4: memref<2x4x8x256xf32, #tpu.memory_space<vmem>>, %arg5: memref<32x512xf32, #tpu.memory_space<vmem>>) attributes {dimension_semantics = [#tpu.dimension_semantics<parallel>], iteration_bounds = array<i64: 1>, scalar_prefetch = 0 : i64, scratch_operands = 1 : i64, tpu.core_type = #tpu.core_type<tc>, window_params = [{transform_indices = @transform_0, window_bounds = array<i64: 2, 8, 256>}, {pipeline_mode = #tpu.pipeline_mode<synchronous>, transform_indices = @transform_1, window_bounds = array<i64: 4, 256>}, {pipeline_mode = #tpu.pipeline_mode<synchronous>, transform_indices = @transform_2, window_bounds = array<i64: 32, 32>}, {transform_indices = @transform_3, window_bounds = array<i64: 2, 4, 8, 256>}]} {
    %c0 = arith.constant 0 : index
    %c0_0 = arith.constant 0 : index
    %0 = vector.load %arg2[%c0, %c0_0] : memref<4x256xf32, #tpu.memory_space<vmem>>, vector<4x256xf32>
    %c0_1 = arith.constant 0 : index
    %c0_2 = arith.constant 0 : index
    %c0_3 = arith.constant 0 : index
    %1 = vector.load %arg1[%c0_1, %c0_2, %c0_3] : memref<2x8x256xf32, #tpu.memory_space<vmem>>, vector<1x8x256xf32>
    %2 = vector.shape_cast %1 : vector<1x8x256xf32> to vector<8x256xf32>
    %c0_4 = arith.constant 0 : index
    %c0_5 = arith.constant 0 : index
    %3 = vector.load %arg5[%c0_4, %c0_5] : memref<32x512xf32, #tpu.memory_space<vmem>>, vector<8x256xf32>
    tpu.vector_store %arg5[%c0_4, %c0_5], %2 {strides = array<i32>} : memref<32x512xf32, #tpu.memory_space<vmem>>, vector<8x256xf32>,
    %c255_i32 = arith.constant 255 : i32
    %4 = tpu.dynamic_rotate %2 by %c255_i32 dim 1 : vector<8x256xf32>, i32 -> vector<8x256xf32>
    %5 = vector.extract_strided_slice %0 {offsets = [1, 0], sizes = [1, 256], strides = [1, 1]} : vector<4x256xf32> to vector<1x256xf32>
    %6 = vector.broadcast %5 : vector<1x256xf32> to vector<8x256xf32>
    %7 = arith.mulf %4, %6 : vector<8x256xf32>
    %c8 = arith.constant 8 : index
    %c0_6 = arith.constant 0 : index
    %8 = vector.load %arg5[%c8, %c0_6] : memref<32x512xf32, #tpu.memory_space<vmem>>, vector<8x256xf32>
    tpu.vector_store %arg5[%c8, %c0_6], %7 {strides = array<i32>} : memref<32x512xf32, #tpu.memory_space<vmem>>, vector<8x256xf32>,
    %c240_i32 = arith.constant 240 : i32
    %9 = tpu.dynamic_rotate %2 by %c240_i32 dim 1 : vector<8x256xf32>, i32 -> vector<8x256xf32>
    %10 = vector.extract_strided_slice %0 {offsets = [2, 0], sizes = [1, 256], strides = [1, 1]} : vector<4x256xf32> to vector<1x256xf32>
    %11 = vector.broadcast %10 : vector<1x256xf32> to vector<8x256xf32>
    %12 = arith.mulf %9, %11 : vector<8x256xf32>
    %c16 = arith.constant 16 : index
    %c0_7 = arith.constant 0 : index
    %13 = vector.load %arg5[%c16, %c0_7] : memref<32x512xf32, #tpu.memory_space<vmem>>, vector<8x256xf32>
    tpu.vector_store %arg5[%c16, %c0_7], %12 {strides = array<i32>} : memref<32x512xf32, #tpu.memory_space<vmem>>, vector<8x256xf32>,
    %c239_i32 = arith.constant 239 : i32
    %14 = tpu.dynamic_rotate %2 by %c239_i32 dim 1 : vector<8x256xf32>, i32 -> vector<8x256xf32>
    %15 = vector.extract_strided_slice %0 {offsets = [3, 0], sizes = [1, 256], strides = [1, 1]} : vector<4x256xf32> to vector<1x256xf32>
    %16 = vector.broadcast %15 : vector<1x256xf32> to vector<8x256xf32>
    %17 = arith.mulf %14, %16 : vector<8x256xf32>
    %c24 = arith.constant 24 : index
    %c0_8 = arith.constant 0 : index
    %18 = vector.load %arg5[%c24, %c0_8] : memref<32x512xf32, #tpu.memory_space<vmem>>, vector<8x256xf32>
    tpu.vector_store %arg5[%c24, %c0_8], %17 {strides = array<i32>} : memref<32x512xf32, #tpu.memory_space<vmem>>, vector<8x256xf32>,
    %c1 = arith.constant 1 : index
    %c0_9 = arith.constant 0 : index
    %c0_10 = arith.constant 0 : index
    %19 = vector.load %arg1[%c1, %c0_9, %c0_10] : memref<2x8x256xf32, #tpu.memory_space<vmem>>, vector<1x8x256xf32>
    %20 = vector.shape_cast %19 : vector<1x8x256xf32> to vector<8x256xf32>
    %c0_11 = arith.constant 0 : index
    %c256 = arith.constant 256 : index
    %21 = vector.load %arg5[%c0_11, %c256] : memref<32x512xf32, #tpu.memory_space<vmem>>, vector<8x256xf32>
    tpu.vector_store %arg5[%c0_11, %c256], %20 {strides = array<i32>} : memref<32x512xf32, #tpu.memory_space<vmem>>, vector<8x256xf32>,
    %c255_i32_12 = arith.constant 255 : i32
    %22 = tpu.dynamic_rotate %20 by %c255_i32_12 dim 1 : vector<8x256xf32>, i32 -> vector<8x256xf32>
    %23 = vector.extract_strided_slice %0 {offsets = [1, 0], sizes = [1, 256], strides = [1, 1]} : vector<4x256xf32> to vector<1x256xf32>
    %24 = vector.broadcast %23 : vector<1x256xf32> to vector<8x256xf32>
    %25 = arith.mulf %22, %24 : vector<8x256xf32>
    %c8_13 = arith.constant 8 : index
    %c256_14 = arith.constant 256 : index
    %26 = vector.load %arg5[%c8_13, %c256_14] : memref<32x512xf32, #tpu.memory_space<vmem>>, vector<8x256xf32>
    tpu.vector_store %arg5[%c8_13, %c256_14], %25 {strides = array<i32>} : memref<32x512xf32, #tpu.memory_space<vmem>>, vector<8x256xf32>,
    %c240_i32_15 = arith.constant 240 : i32
    %27 = tpu.dynamic_rotate %20 by %c240_i32_15 dim 1 : vector<8x256xf32>, i32 -> vector<8x256xf32>
    %28 = vector.extract_strided_slice %0 {offsets = [2, 0], sizes = [1, 256], strides = [1, 1]} : vector<4x256xf32> to vector<1x256xf32>
    %29 = vector.broadcast %28 : vector<1x256xf32> to vector<8x256xf32>
    %30 = arith.mulf %27, %29 : vector<8x256xf32>
    %c16_16 = arith.constant 16 : index
    %c256_17 = arith.constant 256 : index
    %31 = vector.load %arg5[%c16_16, %c256_17] : memref<32x512xf32, #tpu.memory_space<vmem>>, vector<8x256xf32>
    tpu.vector_store %arg5[%c16_16, %c256_17], %30 {strides = array<i32>} : memref<32x512xf32, #tpu.memory_space<vmem>>, vector<8x256xf32>,
    %c239_i32_18 = arith.constant 239 : i32
    %32 = tpu.dynamic_rotate %20 by %c239_i32_18 dim 1 : vector<8x256xf32>, i32 -> vector<8x256xf32>
    %33 = vector.extract_strided_slice %0 {offsets = [3, 0], sizes = [1, 256], strides = [1, 1]} : vector<4x256xf32> to vector<1x256xf32>
    %34 = vector.broadcast %33 : vector<1x256xf32> to vector<8x256xf32>
    %35 = arith.mulf %32, %34 : vector<8x256xf32>
    %c24_19 = arith.constant 24 : index
    %c256_20 = arith.constant 256 : index
    %36 = vector.load %arg5[%c24_19, %c256_20] : memref<32x512xf32, #tpu.memory_space<vmem>>, vector<8x256xf32>
    tpu.vector_store %arg5[%c24_19, %c256_20], %35 {strides = array<i32>} : memref<32x512xf32, #tpu.memory_space<vmem>>, vector<8x256xf32>,
    %c0_21 = arith.constant 0 : index
    %c0_22 = arith.constant 0 : index
    %37 = vector.load %arg3[%c0_21, %c0_22] : memref<32x32xf32, #tpu.memory_space<vmem>>, vector<32x32xf32>
    %c0_23 = arith.constant 0 : index
    %c0_24 = arith.constant 0 : index
    %38 = vector.load %arg5[%c0_23, %c0_24] : memref<32x512xf32, #tpu.memory_space<vmem>>, vector<32x512xf32>
    %cst = arith.constant dense<0.000000e+00> : vector<32x512xf32>
    %39 = tpu.matmul %37, %38, %cst {dimension_numbers = #tpu.dot_dimension_numbers<[1], [0], [0], [1], [0, 0, 1, 1], [], []>} : vector<32x32xf32>, vector<32x512xf32>, vector<32x512xf32> -> vector<32x512xf32>
    %40 = vector.extract_strided_slice %39 {offsets = [0, 0], sizes = [8, 512], strides = [1, 1]} : vector<32x512xf32> to vector<8x512xf32>
    %41 = vector.extract_strided_slice %39 {offsets = [8, 0], sizes = [8, 512], strides = [1, 1]} : vector<32x512xf32> to vector<8x512xf32>
    %42 = arith.addf %40, %41 : vector<8x512xf32>
    %43 = vector.extract_strided_slice %39 {offsets = [16, 0], sizes = [8, 512], strides = [1, 1]} : vector<32x512xf32> to vector<8x512xf32>
    %44 = arith.addf %42, %43 : vector<8x512xf32>
    %45 = vector.extract_strided_slice %39 {offsets = [24, 0], sizes = [8, 512], strides = [1, 1]} : vector<32x512xf32> to vector<8x512xf32>
    %46 = arith.addf %44, %45 : vector<8x512xf32>
    %47 = vector.extract_strided_slice %46 {offsets = [0, 0], sizes = [8, 256], strides = [1, 1]} : vector<8x512xf32> to vector<8x256xf32>
    %cst_25 = arith.constant dense<0.000000e+00> : vector<8xf32>
    %48 = vector.multi_reduction <add>, %47, %cst_25 [1] : vector<8x256xf32> to vector<8xf32>
    %49 = vector.shape_cast %48 : vector<8xf32> to vector<8x1xf32>
    %cst_26 = arith.constant 9.765625E-4 : f32
    %50 = vector.broadcast %cst_26 : f32 to vector<8x1xf32>
    %51 = arith.mulf %49, %50 : vector<8x1xf32>
    %52 = vector.extract_strided_slice %39 {offsets = [0, 0], sizes = [8, 256], strides = [1, 1]} : vector<32x512xf32> to vector<8x256xf32>
    %53 = vector.broadcast %51 : vector<8x1xf32> to vector<8x256xf32>
    %54 = arith.subf %52, %53 : vector<8x256xf32>
    %55 = arith.mulf %54, %54 : vector<8x256xf32>
    %56 = vector.extract_strided_slice %39 {offsets = [8, 0], sizes = [8, 256], strides = [1, 1]} : vector<32x512xf32> to vector<8x256xf32>
    %57 = vector.broadcast %51 : vector<8x1xf32> to vector<8x256xf32>
    %58 = arith.subf %56, %57 : vector<8x256xf32>
    %59 = arith.mulf %58, %58 : vector<8x256xf32>
    %60 = arith.addf %55, %59 : vector<8x256xf32>
    %61 = vector.extract_strided_slice %39 {offsets = [16, 0], sizes = [8, 256], strides = [1, 1]} : vector<32x512xf32> to vector<8x256xf32>
    %62 = vector.broadcast %51 : vector<8x1xf32> to vector<8x256xf32>
    %63 = arith.subf %61, %62 : vector<8x256xf32>
    %64 = arith.mulf %63, %63 : vector<8x256xf32>
    %65 = arith.addf %60, %64 : vector<8x256xf32>
    %66 = vector.extract_strided_slice %39 {offsets = [24, 0], sizes = [8, 256], strides = [1, 1]} : vector<32x512xf32> to vector<8x256xf32>
    %67 = vector.broadcast %51 : vector<8x1xf32> to vector<8x256xf32>
    %68 = arith.subf %66, %67 : vector<8x256xf32>
    %69 = arith.mulf %68, %68 : vector<8x256xf32>
    %70 = arith.addf %65, %69 : vector<8x256xf32>
    %cst_27 = arith.constant dense<0.000000e+00> : vector<8xf32>
    %71 = vector.multi_reduction <add>, %70, %cst_27 [1] : vector<8x256xf32> to vector<8xf32>
    %72 = vector.shape_cast %71 : vector<8xf32> to vector<8x1xf32>
    %cst_28 = arith.constant 9.765625E-4 : f32
    %73 = vector.broadcast %cst_28 : f32 to vector<8x1xf32>
    %74 = arith.mulf %72, %73 : vector<8x1xf32>
    %cst_29 = arith.constant 9.99999974E-6 : f32
    %75 = vector.broadcast %cst_29 : f32 to vector<8x1xf32>
    %76 = arith.addf %74, %75 : vector<8x1xf32>
    %77 = math.rsqrt %76 : vector<8x1xf32>
    %78 = vector.broadcast %77 : vector<8x1xf32> to vector<8x256xf32>
    %79 = arith.mulf %54, %78 : vector<8x256xf32>
    %cst_30 = arith.constant 0.000000e+00 : f32
    %80 = vector.broadcast %cst_30 : f32 to vector<8x256xf32>
    %81 = arith.maximumf %79, %80 : vector<8x256xf32>
    %c0_31 = arith.constant 0 : index
    %c0_32 = arith.constant 0 : index
    %c0_33 = arith.constant 0 : index
    %c0_34 = arith.constant 0 : index
    %82 = vector.load %arg4[%c0_31, %c0_32, %c0_33, %c0_34] : memref<2x4x8x256xf32, #tpu.memory_space<vmem>>, vector<1x1x8x256xf32>
    %83 = vector.shape_cast %82 : vector<1x1x8x256xf32> to vector<8x256xf32>
    %84 = vector.shape_cast %81 : vector<8x256xf32> to vector<1x1x8x256xf32>
    tpu.vector_store %arg4[%c0_31, %c0_32, %c0_33, %c0_34], %84 {strides = array<i32>} : memref<2x4x8x256xf32, #tpu.memory_space<vmem>>, vector<1x1x8x256xf32>,
    %85 = vector.broadcast %77 : vector<8x1xf32> to vector<8x256xf32>
    %86 = arith.mulf %58, %85 : vector<8x256xf32>
    %cst_35 = arith.constant 0.000000e+00 : f32
    %87 = vector.broadcast %cst_35 : f32 to vector<8x256xf32>
    %88 = arith.maximumf %86, %87 : vector<8x256xf32>
    %c0_36 = arith.constant 0 : index
    %c1_37 = arith.constant 1 : index
    %c0_38 = arith.constant 0 : index
    %c0_39 = arith.constant 0 : index
    %89 = vector.load %arg4[%c0_36, %c1_37, %c0_38, %c0_39] : memref<2x4x8x256xf32, #tpu.memory_space<vmem>>, vector<1x1x8x256xf32>
    %90 = vector.shape_cast %89 : vector<1x1x8x256xf32> to vector<8x256xf32>
    %91 = vector.shape_cast %88 : vector<8x256xf32> to vector<1x1x8x256xf32>
    tpu.vector_store %arg4[%c0_36, %c1_37, %c0_38, %c0_39], %91 {strides = array<i32>} : memref<2x4x8x256xf32, #tpu.memory_space<vmem>>, vector<1x1x8x256xf32>,
    %92 = vector.broadcast %77 : vector<8x1xf32> to vector<8x256xf32>
    %93 = arith.mulf %63, %92 : vector<8x256xf32>
    %cst_40 = arith.constant 0.000000e+00 : f32
    %94 = vector.broadcast %cst_40 : f32 to vector<8x256xf32>
    %95 = arith.maximumf %93, %94 : vector<8x256xf32>
    %c0_41 = arith.constant 0 : index
    %c2 = arith.constant 2 : index
    %c0_42 = arith.constant 0 : index
    %c0_43 = arith.constant 0 : index
    %96 = vector.load %arg4[%c0_41, %c2, %c0_42, %c0_43] : memref<2x4x8x256xf32, #tpu.memory_space<vmem>>, vector<1x1x8x256xf32>
    %97 = vector.shape_cast %96 : vector<1x1x8x256xf32> to vector<8x256xf32>
    %98 = vector.shape_cast %95 : vector<8x256xf32> to vector<1x1x8x256xf32>
    tpu.vector_store %arg4[%c0_41, %c2, %c0_42, %c0_43], %98 {strides = array<i32>} : memref<2x4x8x256xf32, #tpu.memory_space<vmem>>, vector<1x1x8x256xf32>,
    %99 = vector.broadcast %77 : vector<8x1xf32> to vector<8x256xf32>
    %100 = arith.mulf %68, %99 : vector<8x256xf32>
    %cst_44 = arith.constant 0.000000e+00 : f32
    %101 = vector.broadcast %cst_44 : f32 to vector<8x256xf32>
    %102 = arith.maximumf %100, %101 : vector<8x256xf32>
    %c0_45 = arith.constant 0 : index
    %c3 = arith.constant 3 : index
    %c0_46 = arith.constant 0 : index
    %c0_47 = arith.constant 0 : index
    %103 = vector.load %arg4[%c0_45, %c3, %c0_46, %c0_47] : memref<2x4x8x256xf32, #tpu.memory_space<vmem>>, vector<1x1x8x256xf32>
    %104 = vector.shape_cast %103 : vector<1x1x8x256xf32> to vector<8x256xf32>
    %105 = vector.shape_cast %102 : vector<8x256xf32> to vector<1x1x8x256xf32>
    tpu.vector_store %arg4[%c0_45, %c3, %c0_46, %c0_47], %105 {strides = array<i32>} : memref<2x4x8x256xf32, #tpu.memory_space<vmem>>, vector<1x1x8x256xf32>,
    %106 = vector.extract_strided_slice %46 {offsets = [0, 256], sizes = [8, 256], strides = [1, 1]} : vector<8x512xf32> to vector<8x256xf32>
    %cst_48 = arith.constant dense<0.000000e+00> : vector<8xf32>
    %107 = vector.multi_reduction <add>, %106, %cst_48 [1] : vector<8x256xf32> to vector<8xf32>
    %108 = vector.shape_cast %107 : vector<8xf32> to vector<8x1xf32>
    %cst_49 = arith.constant 9.765625E-4 : f32
    %109 = vector.broadcast %cst_49 : f32 to vector<8x1xf32>
    %110 = arith.mulf %108, %109 : vector<8x1xf32>
    %111 = vector.extract_strided_slice %39 {offsets = [0, 256], sizes = [8, 256], strides = [1, 1]} : vector<32x512xf32> to vector<8x256xf32>
    %112 = vector.broadcast %110 : vector<8x1xf32> to vector<8x256xf32>
    %113 = arith.subf %111, %112 : vector<8x256xf32>
    %114 = arith.mulf %113, %113 : vector<8x256xf32>
    %115 = vector.extract_strided_slice %39 {offsets = [8, 256], sizes = [8, 256], strides = [1, 1]} : vector<32x512xf32> to vector<8x256xf32>
    %116 = vector.broadcast %110 : vector<8x1xf32> to vector<8x256xf32>
    %117 = arith.subf %115, %116 : vector<8x256xf32>
    %118 = arith.mulf %117, %117 : vector<8x256xf32>
    %119 = arith.addf %114, %118 : vector<8x256xf32>
    %120 = vector.extract_strided_slice %39 {offsets = [16, 256], sizes = [8, 256], strides = [1, 1]} : vector<32x512xf32> to vector<8x256xf32>
    %121 = vector.broadcast %110 : vector<8x1xf32> to vector<8x256xf32>
    %122 = arith.subf %120, %121 : vector<8x256xf32>
    %123 = arith.mulf %122, %122 : vector<8x256xf32>
    %124 = arith.addf %119, %123 : vector<8x256xf32>
    %125 = vector.extract_strided_slice %39 {offsets = [24, 256], sizes = [8, 256], strides = [1, 1]} : vector<32x512xf32> to vector<8x256xf32>
    %126 = vector.broadcast %110 : vector<8x1xf32> to vector<8x256xf32>
    %127 = arith.subf %125, %126 : vector<8x256xf32>
    %128 = arith.mulf %127, %127 : vector<8x256xf32>
    %129 = arith.addf %124, %128 : vector<8x256xf32>
    %cst_50 = arith.constant dense<0.000000e+00> : vector<8xf32>
    %130 = vector.multi_reduction <add>, %129, %cst_50 [1] : vector<8x256xf32> to vector<8xf32>
    %131 = vector.shape_cast %130 : vector<8xf32> to vector<8x1xf32>
    %cst_51 = arith.constant 9.765625E-4 : f32
    %132 = vector.broadcast %cst_51 : f32 to vector<8x1xf32>
    %133 = arith.mulf %131, %132 : vector<8x1xf32>
    %cst_52 = arith.constant 9.99999974E-6 : f32
    %134 = vector.broadcast %cst_52 : f32 to vector<8x1xf32>
    %135 = arith.addf %133, %134 : vector<8x1xf32>
    %136 = math.rsqrt %135 : vector<8x1xf32>
    %137 = vector.broadcast %136 : vector<8x1xf32> to vector<8x256xf32>
    %138 = arith.mulf %113, %137 : vector<8x256xf32>
    %cst_53 = arith.constant 0.000000e+00 : f32
    %139 = vector.broadcast %cst_53 : f32 to vector<8x256xf32>
    %140 = arith.maximumf %138, %139 : vector<8x256xf32>
    %c1_54 = arith.constant 1 : index
    %c0_55 = arith.constant 0 : index
    %c0_56 = arith.constant 0 : index
    %c0_57 = arith.constant 0 : index
    %141 = vector.load %arg4[%c1_54, %c0_55, %c0_56, %c0_57] : memref<2x4x8x256xf32, #tpu.memory_space<vmem>>, vector<1x1x8x256xf32>
    %142 = vector.shape_cast %141 : vector<1x1x8x256xf32> to vector<8x256xf32>
    %143 = vector.shape_cast %140 : vector<8x256xf32> to vector<1x1x8x256xf32>
    tpu.vector_store %arg4[%c1_54, %c0_55, %c0_56, %c0_57], %143 {strides = array<i32>} : memref<2x4x8x256xf32, #tpu.memory_space<vmem>>, vector<1x1x8x256xf32>,
    %144 = vector.broadcast %136 : vector<8x1xf32> to vector<8x256xf32>
    %145 = arith.mulf %117, %144 : vector<8x256xf32>
    %cst_58 = arith.constant 0.000000e+00 : f32
    %146 = vector.broadcast %cst_58 : f32 to vector<8x256xf32>
    %147 = arith.maximumf %145, %146 : vector<8x256xf32>
    %c1_59 = arith.constant 1 : index
    %c1_60 = arith.constant 1 : index
    %c0_61 = arith.constant 0 : index
    %c0_62 = arith.constant 0 : index
    %148 = vector.load %arg4[%c1_59, %c1_60, %c0_61, %c0_62] : memref<2x4x8x256xf32, #tpu.memory_space<vmem>>, vector<1x1x8x256xf32>
    %149 = vector.shape_cast %148 : vector<1x1x8x256xf32> to vector<8x256xf32>
    %150 = vector.shape_cast %147 : vector<8x256xf32> to vector<1x1x8x256xf32>
    tpu.vector_store %arg4[%c1_59, %c1_60, %c0_61, %c0_62], %150 {strides = array<i32>} : memref<2x4x8x256xf32, #tpu.memory_space<vmem>>, vector<1x1x8x256xf32>,
    %151 = vector.broadcast %136 : vector<8x1xf32> to vector<8x256xf32>
    %152 = arith.mulf %122, %151 : vector<8x256xf32>
    %cst_63 = arith.constant 0.000000e+00 : f32
    %153 = vector.broadcast %cst_63 : f32 to vector<8x256xf32>
    %154 = arith.maximumf %152, %153 : vector<8x256xf32>
    %c1_64 = arith.constant 1 : index
    %c2_65 = arith.constant 2 : index
    %c0_66 = arith.constant 0 : index
    %c0_67 = arith.constant 0 : index
    %155 = vector.load %arg4[%c1_64, %c2_65, %c0_66, %c0_67] : memref<2x4x8x256xf32, #tpu.memory_space<vmem>>, vector<1x1x8x256xf32>
    %156 = vector.shape_cast %155 : vector<1x1x8x256xf32> to vector<8x256xf32>
    %157 = vector.shape_cast %154 : vector<8x256xf32> to vector<1x1x8x256xf32>
    tpu.vector_store %arg4[%c1_64, %c2_65, %c0_66, %c0_67], %157 {strides = array<i32>} : memref<2x4x8x256xf32, #tpu.memory_space<vmem>>, vector<1x1x8x256xf32>,
    %158 = vector.broadcast %136 : vector<8x1xf32> to vector<8x256xf32>
    %159 = arith.mulf %127, %158 : vector<8x256xf32>
    %cst_68 = arith.constant 0.000000e+00 : f32
    %160 = vector.broadcast %cst_68 : f32 to vector<8x256xf32>
    %161 = arith.maximumf %159, %160 : vector<8x256xf32>
    %c1_69 = arith.constant 1 : index
    %c3_70 = arith.constant 3 : index
    %c0_71 = arith.constant 0 : index
    %c0_72 = arith.constant 0 : index
    %162 = vector.load %arg4[%c1_69, %c3_70, %c0_71, %c0_72] : memref<2x4x8x256xf32, #tpu.memory_space<vmem>>, vector<1x1x8x256xf32>
    %163 = vector.shape_cast %162 : vector<1x1x8x256xf32> to vector<8x256xf32>
    %164 = vector.shape_cast %161 : vector<8x256xf32> to vector<1x1x8x256xf32>
    tpu.vector_store %arg4[%c1_69, %c3_70, %c0_71, %c0_72], %164 {strides = array<i32>} : memref<2x4x8x256xf32, #tpu.memory_space<vmem>>, vector<1x1x8x256xf32>,
    return
  }
  func.func @transform_0(%arg0: i32) -> (i32, i32, i32) {
    %c0_i32 = arith.constant 0 : i32
    %c0_i32_0 = arith.constant 0 : i32
    %c0_i32_1 = arith.constant 0 : i32
    return %arg0, %c0_i32, %c0_i32_0 : i32, i32, i32
  }
  func.func @transform_1(%arg0: i32) -> (i32, i32) {
    %c0_i32 = arith.constant 0 : i32
    %c0_i32_0 = arith.constant 0 : i32
    %c0_i32_1 = arith.constant 0 : i32
    return %c0_i32, %c0_i32_0 : i32, i32
  }
  func.func @transform_2(%arg0: i32) -> (i32, i32) {
    %c0_i32 = arith.constant 0 : i32
    %c0_i32_0 = arith.constant 0 : i32
    %c0_i32_1 = arith.constant 0 : i32
    return %c0_i32, %c0_i32_0 : i32, i32
  }
  func.func @transform_3(%arg0: i32) -> (i32, i32, i32, i32) {
    %c0_i32 = arith.constant 0 : i32
    %c0_i32_0 = arith.constant 0 : i32
    %c0_i32_1 = arith.constant 0 : i32
    %c0_i32_2 = arith.constant 0 : i32
    return %arg0, %c0_i32, %c0_i32_0, %c0_i32_1 : i32, i32, i32, i32
  }
}

</mosaic_0001>

<bundles_post_ra>
// kernel: tpu_custom_call.1
= control target key start
LH: loop header
LB: loop body
LE: loop exit
PB: predicated region body
PF: predicated region fallthrough
CT: control target
= control target key end

     0   :  { %8 = vsyncpa [#allocation4], 0  ;;  %s762_s0 = inlined_call_operand.hbm [shape: f32[2,8,256], index: 0, kind: input, shape index: {}]   ;;  %s763_s1 = inlined_call_operand.hbm [shape: f32[4,256], index: 1, kind: input, shape index: {}]   ;;  %s764_s2 = inlined_call_operand.hbm [shape: f32[32,32], index: 2, kind: input, shape index: {}]   ;;  %s765_s3 = inlined_call_operand.hbm [shape: f32[2,4,8,256], index: 3, kind: output, shape index: {}]  }
   0x1   :  { %9 = vsyncpa [#allocation7], 0 }
   0x2   :  { %10 = vsyncpa [#allocation5], 0  ;;  %s654_s12 = smov [#allocation6]   ;;  %s655_s14 = smov [#allocation3]  }
   0x3   :  { %s29_s13 = sshll.u32 %s654_s12, 4  ;;  %s16_s15 = sshll.u32 %s655_s14, 4  ;;  %s30_s13 = int_to_ptr.vmem [resolvable:$true] %s29_s13  ;;  %s17_s15 = int_to_ptr.vmem [resolvable:$true] %s16_s15 }
   0x4   :  { %s576_s16 = scalar_lea.vmem %s30_s13, 128  ;;  %p581_p1 = scmp.lt.s32.totalorder %s30_s13, %s30_s13 }
   0x5   :  { %p577_p0 = scmp.ne.s32.totalorder %s30_s13, %s576_s16  ;;  %p582_p2 = scmp.lt.s32.totalorder %s576_s16, %s576_s16 }
   0x7   :  { %p583_p3 = por %p582_p2, %p581_p1 }
   0x9   :  { %p584_p4 = pnand %p583_p3, %p577_p0 }
   0xb   :  { %587 = shalt.err (!%p584_p4)
}
   0xc   :  { %32 = dma.hbm_to_vmem [thread:$0]  %s763_s1, 128, %s30_s13, [#allocation7]  }
   0xd   :  { %s596_s19 = scalar_lea.vmem %s17_s15, 512  ;;  %p601_p6 = scmp.lt.s32.totalorder %s17_s15, %s17_s15 }
   0xe   :  { %p597_p5 = scmp.ne.s32.totalorder %s17_s15, %s596_s19  ;;  %p602_p7 = scmp.lt.s32.totalorder %s596_s19, %s596_s19 }
  0x10   :  { %p603_p8 = por %p602_p7, %p601_p6 }
  0x12   :  { %p604_p9 = pnand %p603_p8, %p597_p5 }
  0x14   :  { %607 = shalt.err (!%p604_p9)
}
  0x15   :  { %s656_s20 = smov 256   ;;  %s657_s21 = smov 16  }
  0x16   :  { %22 = dma.hbm_to_vmem [thread:$0]  %s762_s0, 512, %s17_s15, [#allocation4], %s656_s20, %s656_s20, %s657_s21  }
  0x17   :  { %s658_s24 = smov [#allocation8]  }
  0x18   :  { %s38_s25 = sshll.u32 %s658_s24, 4  ;;  %s39_s25 = int_to_ptr.vmem [resolvable:$true] %s38_s25 }
  0x19   :  { %s616_s1 = scalar_lea.vmem %s39_s25, 512  ;;  %p621_p11 = scmp.lt.s32.totalorder %s39_s25, %s39_s25 }
  0x1a   :  { %p617_p10 = scmp.ne.s32.totalorder %s39_s25, %s616_s1  ;;  %p622_p12 = scmp.lt.s32.totalorder %s616_s1, %s616_s1 }
  0x1c   :  { %p623_p13 = por %p622_p12, %p621_p11 }
  0x1e   :  { %p624_p0 = pnand %p623_p13, %p617_p10 }
  0x20   :  { %627 = shalt.err (!%p624_p0)
}
  0x21   :  { %s659_s26 = smov 128   ;;  %s660_s27 = smov 8  }
  0x22   :  { %44 = dma.hbm_to_vmem [thread:$0]  %s764_s2, 512, %s39_s25, [#allocation7], %s659_s26, %s659_s26, %s660_s27  }
  0x23   :  { %648 = dma.done.wait [#allocation4], 512  }
  0x24   :  { %649 = vsyncadd [#allocation4], 4294966784 }
  0x25   :  { %650 = dma.done.wait [#allocation7], 640  }
  0x26   :  { %651 = vsyncadd [#allocation7], 4294966656  ;;  %v698_v0 = vld [vmem:[#allocation3 + $0x10] sm:$0xff]  ;;  %v700_v1 = vld [vmem:[#allocation3] sm:$0xff]  ;;  %s661_s0 = smov 111   ;;  %s662_s2 = smov 112   ;;  %v63_v5 = vlaneseq }
  0x27   :  { %174 = vrot.lane.b32.xlu1 %v698_v0, %s661_s0  ;;  %120 = vrot.lane.b32.xlu0 %v700_v1, %s661_s0  ;;  %v704_v2 = vld [vmem:[#allocation3 + $0x18] sm:$0xff]  ;;  %v706_v3 = vld [vmem:[#allocation3 + $0x8] sm:$0xff]  ;;  %v663_v4 = vmov 0.0   ;;  %s664_s30 = smov 127   ;;  %v54_v9 = vld [vmem:[#allocation6] sm:$0xff]  ;;  %vm204_vm3 = vcmask 261120  }
  0x28   :  { %281 = vmatprep.mubr.f32.mxu0 %v663_v4  ;;  %370 = vmatprep.mubr.f32.mxu1 %v663_v4  ;;  %v70_v6 = vshrl.u32 %v63_v5, 7  ;;  %v64_v12 = vand.u32 127, %v63_v5  ;;  %v184_v61 = vld [vmem:[#allocation8] sm:$0xff]  ;;  %v185_v5 = vld [vmem:[#allocation8 + $0x8] sm:$0xff]  ;;  %s665_s4 = smov [#allocation9]  }
  0x29   :  { %s531_s5 = sshll.u32 %s665_s4, 4  ;;  %s532_s5 = int_to_ptr.vmem [resolvable:$true] %s531_s5 }
  0x2a   :  { %v129_v7 = vsub.s32 3, %v70_v6  ;;  %v133_v8 = vsub.s32 7, %v70_v6  ;;  %v100_v10 = vsub.s32 2, %v70_v6  ;;  %v104_v11 = vsub.s32 6, %v70_v6  ;;  %s628_s6 = scalar_lea.vmem %s532_s5, 2048  ;;  %p633_p2 = scmp.lt.s32.totalorder %s532_s5, %s532_s5 }
  0x2b   :  { %176 = vrot.lane.b32.xlu1 %v704_v2, %s661_s0  ;;  %122 = vrot.lane.b32.xlu0 %v706_v3, %s661_s0  ;;  %vm124_vm0 = vcmp.lt.s32.totalorder %v64_v12, 111  ;;  %vm95_vm1 = vcmp.lt.s32.totalorder %v64_v12, 112  ;;  %v71_v25 = vsub.s32 1, %v70_v6  ;;  %v75_v26 = vsub.s32 5, %v70_v6  ;;  %p629_p1 = scmp.ne.s32.totalorder %s532_s5, %s628_s6  ;;  %p634_p3 = scmp.lt.s32.totalorder %s628_s6, %s628_s6 }
  0x2c   :  { %v134_v13 = vrot.slane %v54_v9, %v133_v8  ;;  %v130_v14 = vrot.slane %v54_v9, %v129_v7  ;;  %v101_v17 = vrot.slane %v54_v9, %v100_v10  ;;  %v105_v18 = vrot.slane %v54_v9, %v104_v11 }
  0x2d   :  { %v72_v41 = vrot.slane %v54_v9, %v71_v25  ;;  %v76_v42 = vrot.slane %v54_v9, %v75_v26  ;;  %vm65_vm2 = vcmp.lt.s32.totalorder %v64_v12, 127  ;;  %p635_p4 = por %p634_p3, %p633_p2 }
  0x2e   :  { %v144_v19 = vrot.slane %v134_v13, %v129_v7  ;;  %v140_v20 = vrot.slane %v130_v14, %v129_v7  ;;  %v111_v23 = vrot.slane %v101_v17, %v100_v10  ;;  %v115_v24 = vrot.slane %v105_v18, %v100_v10 }
  0x2f   :  { %93 = vrot.lane.b32.xlu1 %v706_v3, %s662_s2  ;;  %91 = vrot.lane.b32.xlu0 %v700_v1, %s662_s2  ;;  %v82_v49 = vrot.slane %v72_v41, %v71_v25  ;;  %v86_v50 = vrot.slane %v76_v42, %v71_v25  ;;  %p636_p5 = pnand %p635_p4, %p629_p1 }
  0x33   :  { %166 = vrot.lane.b32.xlu1 %v704_v2, %s662_s2  ;;  %164 = vrot.lane.b32.xlu0 %v698_v0, %s662_s2 }
  0x37   :  { %61 = vrot.lane.b32.xlu1 %v706_v3, %s664_s30  ;;  %59 = vrot.lane.b32.xlu0 %v700_v1, %s664_s30 }
  0x3b   :  { %156 = vrot.lane.b32.xlu1 %v704_v2, %s664_s30  ;;  %154 = vrot.lane.b32.xlu0 %v698_v0, %s664_s30 }
  0x99   :  { %v175_v15 = vpop.permute.xlu1 %174  ;;  %v121_v16 = vpop.permute.xlu0 %120 }
  0x9d   :  { %v177_v21 = vpop.permute.xlu1 %176  ;;  %v123_v22 = vpop.permute.xlu0 %122 }
  0x9e   :  { %v178_v27 = vsel %vm124_vm0, %v175_v15, %v177_v21  ;;  %v125_v28 = vsel %vm124_vm0, %v121_v16, %v123_v22  ;;  %v126_v29 = vsel %vm124_vm0, %v123_v22, %v121_v16  ;;  %v179_v30 = vsel %vm124_vm0, %v177_v21, %v175_v15 }
  0x9f   :  { %v146_v31 = vmul.f32 %v144_v19, %v126_v29  ;;  %v181_v32 = vmul.f32 %v179_v30, %v144_v19  ;;  %v145_v33 = vmul.f32 %v140_v20, %v125_v28  ;;  %v180_v34 = vmul.f32 %v178_v27, %v140_v20 }
  0xa1   :  { %v94_v35 = vpop.permute.xlu1 %93  ;;  %v92_v36 = vpop.permute.xlu0 %91  ;;  %241 = vmatprep.subr.mxu0 %v146_v31  ;;  %330 = vmatprep.subr.mxu1 %v181_v32 }
  0xa2   :  { %v96_v37 = vsel %vm95_vm1, %v92_v36, %v94_v35  ;;  %v97_v38 = vsel %vm95_vm1, %v94_v35, %v92_v36  ;;  %242 = vmatpush1.msra.mxu0 %v145_v33  ;;  %331 = vmatpush1.msra.mxu1 %v180_v34 }
  0xa3   :  { %v116_v39 = vmul.f32 %v111_v23, %v96_v37  ;;  %v117_v40 = vmul.f32 %v115_v24, %v97_v38 }
  0xa5   :  { %v167_v43 = vpop.permute.xlu1 %166  ;;  %v165_v44 = vpop.permute.xlu0 %164  ;;  %243 = vmatprep.subr.mxu0 %v117_v40 }
  0xa6   :  { %v168_v45 = vsel %vm95_vm1, %v165_v44, %v167_v43  ;;  %v169_v46 = vsel %vm95_vm1, %v167_v43, %v165_v44  ;;  %244 = vmatpush1.msra.mxu0 %v116_v39 }
  0xa7   :  { %v170_v47 = vmul.f32 %v168_v45, %v111_v23  ;;  %v171_v48 = vmul.f32 %v169_v46, %v115_v24 }
  0xa9   :  { %v62_v51 = vpop.permute.xlu1 %61  ;;  %v60_v52 = vpop.permute.xlu0 %59  ;;  %332 = vmatprep.subr.mxu1 %v171_v48 }
  0xaa   :  { %v66_v53 = vsel %vm65_vm2, %v60_v52, %v62_v51  ;;  %v67_v54 = vsel %vm65_vm2, %v62_v51, %v60_v52  ;;  %333 = vmatpush1.msra.mxu1 %v170_v47 }
  0xab   :  { %v87_v55 = vmul.f32 %v82_v49, %v66_v53  ;;  %v88_v56 = vmul.f32 %v86_v50, %v67_v54 }
  0xad   :  { %v157_v57 = vpop.permute.xlu1 %156  ;;  %v155_v58 = vpop.permute.xlu0 %154  ;;  %245 = vmatprep.subr.mxu0 %v88_v56 }
  0xae   :  { %v158_v59 = vsel %vm65_vm2, %v155_v58, %v157_v57  ;;  %v159_v60 = vsel %vm65_vm2, %v157_v57, %v155_v58  ;;  %246 = vmatpush1.msra.mxu0 %v87_v55 }
  0xaf   :  { %v160_v62 = vmul.f32 %v158_v59, %v82_v49  ;;  %v161_v63 = vmul.f32 %v159_v60, %v86_v50  ;;  %247 = vmatprep.subr.mxu0 %v706_v3 }
  0xb0   :  { %248 = vmatpush1.msra.mxu0 %v700_v1  ;;  %v186_v1 = vld [vmem:[#allocation8 + $0x10] sm:$0xff] }
  0xb1   :  { %544 = vmatmul.mubr.msk.f32.vlgmr.msra.gmra.mxu0 %vm204_vm3, %v184_v61  ;;  %334 = vmatprep.subr.mxu1 %v161_v63 }
  0xb2   :  { %335 = vmatpush1.msra.mxu1 %v160_v62  ;;  %287 = vmatprep.mubr.f32.mxu0 %v663_v4 }
  0xb3   :  { %336 = vmatprep.subr.mxu1 %v704_v2  ;;  %v187_v2 = vld [vmem:[#allocation8 + $0x18] sm:$0xff] }
  0xb4   :  { %337 = vmatpush1.msra.mxu1 %v698_v0 }
  0xb5   :  { %545 = vmatmul.mubr.msk.f32.gmra.mxu0 %vm204_vm3, %v185_v5  ;;  %548 = vmatmul.mubr.msk.f32.vlgmr.msra.gmra.mxu1 %vm204_vm3, %v184_v61 }
  0xb6   :  { %293 = vmatprep.mubr.f32.mxu0 %v663_v4  ;;  %376 = vmatprep.mubr.f32.mxu1 %v663_v4 }
  0xb9   :  { %546 = vmatmul.mubr.msk.f32.gmra.mxu0 %vm204_vm3, %v186_v1  ;;  %549 = vmatmul.mubr.msk.f32.gmra.mxu1 %vm204_vm3, %v185_v5 }
  0xba   :  { %299 = vmatprep.mubr.f32.mxu0 %v663_v4  ;;  %382 = vmatprep.mubr.f32.mxu1 %v663_v4 }
  0xbd   :  { %547 = vmatmul.mubr.msk.f32.gmra.mxu0 %vm204_vm3, %v187_v2  ;;  %550 = vmatmul.mubr.msk.f32.gmra.mxu1 %vm204_vm3, %v186_v1 }
  0xbe   :  { %388 = vmatprep.mubr.f32.mxu1 %v663_v4 }
  0xc1   :  { %551 = vmatmul.mubr.msk.f32.gmra.mxu1 %vm204_vm3, %v187_v2 }
 0x171   :  { %v283_v0 = vpop.f32.mrf.mxu0 }
 0x173   :  { %v285_v3 = vpop.f32.mrf.mxu0 }
 0x175   :  { %v289_v6 = vpop.f32.mrf.mxu0  ;;  %v372_v7 = vpop.f32.mrf.mxu1 }
 0x176   :  { %v395_v14 = vadd.f32 %v289_v6, %v283_v0 }
 0x177   :  { %v291_v8 = vpop.f32.mrf.mxu0  ;;  %v374_v9 = vpop.f32.mrf.mxu1 }
 0x178   :  { %v396_v15 = vadd.f32 %v291_v8, %v285_v3 }
 0x179   :  { %v295_v10 = vpop.f32.mrf.mxu0  ;;  %v378_v11 = vpop.f32.mrf.mxu1 }
 0x17a   :  { %v399_v18 = vadd.f32 %v395_v14, %v295_v10  ;;  %v397_v21 = vadd.f32 %v378_v11, %v372_v7 }
 0x17b   :  { %v297_v12 = vpop.f32.mrf.mxu0  ;;  %v380_v13 = vpop.f32.mrf.mxu1 }
 0x17c   :  { %v400_v19 = vadd.f32 %v396_v15, %v297_v12  ;;  %v398_v22 = vadd.f32 %v380_v13, %v374_v9 }
 0x17d   :  { %v301_v16 = vpop.f32.mrf.mxu0  ;;  %v384_v17 = vpop.f32.mrf.mxu1 }
 0x17e   :  { %v403_v23 = vadd.f32 %v399_v18, %v301_v16  ;;  %v401_v26 = vadd.f32 %v397_v21, %v384_v17 }
 0x17f   :  { %v303_v20 = vpop.f32.mrf.mxu0  ;;  %v386_v4 = vpop.f32.mrf.mxu1 }
 0x180   :  { %v404_v24 = vadd.f32 %v400_v19, %v303_v20  ;;  %v402_v27 = vadd.f32 %v398_v22, %v386_v4 }
 0x181   :  { %v390_v25 = vpop.f32.mrf.mxu1 }
 0x182   :  { %v407_v28 = vadd.f32 %v404_v24, %v403_v23  ;;  %v405_v30 = vadd.f32 %v401_v26, %v390_v25 }
 0x183   :  { %v392_v29 = vpop.f32.mrf.mxu1 }
 0x184   :  { %v406_v31 = vadd.f32 %v402_v27, %v392_v29  ;;  %408 = vadd.xlane.f32.xlu0 %v407_v28 }
 0x186   :  { %v466_v32 = vadd.f32 %v406_v31, %v405_v30 }
 0x188   :  { %467 = vadd.xlane.f32.xlu1 %v466_v32 }
 0x20d   :  { %v409_v33 = vpop.xlane.xlu0 %408 }
 0x20e   :  { %v410_v34 = vmul.f32 0.0009765625, %v409_v33 }
 0x210   :  { %v411_v35 = vsub.f32 %v283_v0, %v410_v34  ;;  %v412_v36 = vsub.f32 %v285_v3, %v410_v34  ;;  %v415_v37 = vsub.f32 %v289_v6, %v410_v34  ;;  %v416_v38 = vsub.f32 %v291_v8, %v410_v34 }
 0x211   :  { %v468_v39 = vpop.xlane.xlu1 %467  ;;  %v421_v40 = vsub.f32 %v295_v10, %v410_v34  ;;  %v422_v41 = vsub.f32 %v297_v12, %v410_v34  ;;  %v427_v42 = vsub.f32 %v301_v16, %v410_v34  ;;  %v428_v50 = vsub.f32 %v303_v20, %v410_v34 }
 0x212   :  { %v469_v43 = vmul.f32 0.0009765625, %v468_v39  ;;  %v413_v44 = vmul.f32 %v411_v35, %v411_v35  ;;  %v414_v45 = vmul.f32 %v412_v36, %v412_v36  ;;  %v417_v46 = vmul.f32 %v415_v37, %v415_v37 }
 0x213   :  { %v418_v47 = vmul.f32 %v416_v38, %v416_v38  ;;  %v423_v48 = vmul.f32 %v421_v40, %v421_v40  ;;  %v424_v49 = vmul.f32 %v422_v41, %v422_v41  ;;  %v429_v52 = vmul.f32 %v427_v42, %v427_v42 }
 0x214   :  { %v419_v51 = vadd.f32 %v417_v46, %v413_v44  ;;  %v470_v53 = vsub.f32 %v372_v7, %v469_v43  ;;  %v471_v54 = vsub.f32 %v374_v9, %v469_v43  ;;  %v474_v56 = vsub.f32 %v378_v11, %v469_v43 }
 0x215   :  { %v420_v55 = vadd.f32 %v418_v47, %v414_v45  ;;  %v475_v57 = vsub.f32 %v380_v13, %v469_v43  ;;  %v746_v58 = vsub.f32 %v384_v17, %v469_v43  ;;  %v748_v62 = vsub.f32 %v386_v4, %v469_v43 }
 0x216   :  { %v425_v59 = vadd.f32 %v423_v48, %v419_v51  ;;  %v472_v60 = vmul.f32 %v470_v53, %v470_v53  ;;  %v473_v61 = vmul.f32 %v471_v54, %v471_v54  ;;  %v430_v5 = vmul.f32 %v428_v50, %v428_v50 }
 0x217   :  { %v426_v63 = vadd.f32 %v424_v49, %v420_v55  ;;  %v476_v1 = vmul.f32 %v474_v56, %v474_v56  ;;  %v477_v2 = vmul.f32 %v475_v57, %v475_v57  ;;  %v482_v3 = vmul.f32 %v746_v58, %v746_v58 }
 0x218   :  { %v431_v0 = vadd.f32 %v429_v52, %v425_v59  ;;  %v486_v6 = vsub.f32 %v390_v25, %v469_v43  ;;  %v487_v7 = vsub.f32 %v392_v29, %v469_v43  ;;  %v483_v11 = vmul.f32 %v748_v62, %v748_v62 }
 0x219   :  { %v432_v8 = vadd.f32 %v430_v5, %v426_v63  ;;  %v478_v9 = vadd.f32 %v476_v1, %v472_v60  ;;  %v479_v10 = vadd.f32 %v477_v2, %v473_v61 }
 0x21a   :  { %v488_v12 = vmul.f32 %v486_v6, %v486_v6  ;;  %v489_v16 = vmul.f32 %v487_v7, %v487_v7 }
 0x21b   :  { %v433_v13 = vadd.f32 %v432_v8, %v431_v0  ;;  %v484_v14 = vadd.f32 %v482_v3, %v478_v9  ;;  %v485_v15 = vadd.f32 %v483_v11, %v479_v10 }
 0x21d   :  { %434 = vadd.xlane.f32.xlu0 %v433_v13  ;;  %v490_v17 = vadd.f32 %v488_v12, %v484_v14  ;;  %v491_v18 = vadd.f32 %v489_v16, %v485_v15 }
 0x21f   :  { %v492_v19 = vadd.f32 %v491_v18, %v490_v17 }
 0x221   :  { %493 = vadd.xlane.f32.xlu0 %v492_v19 }
 0x2a6   :  { %v435_v20 = vpop.xlane.xlu0 %434 }
 0x2a7   :  { %v436_v4 = vmul.f32 0.0009765625, %v435_v20 }
 0x2a9   :  { %v437_v21 = vadd.f32 1e-05, %v436_v4 }
 0x2aa   :  { %v494_v22 = vpop.xlane.xlu0 %493 }
 0x2ab   :  { %564 = vrsqrt.f32 %v437_v21  ;;  %v495_v23 = vmul.f32 0.0009765625, %v494_v22 }
 0x2ad   :  { %v496_v24 = vadd.f32 1e-05, %v495_v23 }
 0x2af   :  { %566 = vrsqrt.f32 %v496_v24 }
 0x2b8   :  { %v565_v25 = vpop.eup %564 }
 0x2b9   :  { %v439_v26 = vmul.f32 %v565_v25, %v411_v35  ;;  %v440_v27 = vmul.f32 %v565_v25, %v412_v36  ;;  %v445_v28 = vmul.f32 %v565_v25, %v415_v37  ;;  %v446_v29 = vmul.f32 %v565_v25, %v416_v38 }
 0x2ba   :  { %v452_v30 = vmul.f32 %v565_v25, %v421_v40  ;;  %v453_v31 = vmul.f32 %v565_v25, %v422_v41  ;;  %v459_v32 = vmul.f32 %v565_v25, %v427_v42  ;;  %v460_v33 = vmul.f32 %v565_v25, %v428_v50 }
 0x2bb   :  { %v441_v34 = vmax.f32 %v439_v26, 0.0  ;;  %v442_v39 = vmax.f32 %v440_v27, 0.0  ;;  %v447_v43 = vmax.f32 %v445_v28, 0.0  ;;  %v448_v44 = vmax.f32 %v446_v29, 0.0 }
 0x2bc   :  { %v567_v45 = vpop.eup %566  ;;  %v454_v46 = vmax.f32 %v452_v30, 0.0  ;;  %v455_v47 = vmax.f32 %v453_v31, 0.0  ;;  %v461_v48 = vmax.f32 %v459_v32, 0.0  ;;  %v462_v49 = vmax.f32 %v460_v33, 0.0 }
 0x2bd   :  { %443 = vst [vmem:[#allocation9] sm:$0xff] %v441_v34  ;;  %444 = vst [vmem:[#allocation9 + $0x8] sm:$0xff] %v442_v39  ;;  %v498_v35 = vmul.f32 %v567_v45, %v470_v53  ;;  %v499_v36 = vmul.f32 %v567_v45, %v471_v54  ;;  %v505_v37 = vmul.f32 %v567_v45, %v474_v56 }
 0x2be   :  { %450 = vst [vmem:[#allocation9 + $0x10] sm:$0xff] %v447_v43  ;;  %451 = vst [vmem:[#allocation9 + $0x18] sm:$0xff] %v448_v44  ;;  %v506_v38 = vmul.f32 %v567_v45, %v475_v57  ;;  %v512_v40 = vmul.f32 %v567_v45, %v746_v58  ;;  %v513_v41 = vmul.f32 %v567_v45, %v748_v62 }
 0x2bf   :  { %457 = vst [vmem:[#allocation9 + $0x20] sm:$0xff] %v454_v46  ;;  %458 = vst [vmem:[#allocation9 + $0x28] sm:$0xff] %v455_v47  ;;  %v519_v42 = vmul.f32 %v567_v45, %v486_v6  ;;  %v520_v50 = vmul.f32 %v567_v45, %v487_v7  ;;  %v500_v51 = vmax.f32 %v498_v35, 0.0  ;;  %v501_v52 = vmax.f32 %v499_v36, 0.0 }
 0x2c0   :  { %464 = vst [vmem:[#allocation9 + $0x30] sm:$0xff] %v461_v48  ;;  %465 = vst [vmem:[#allocation9 + $0x38] sm:$0xff] %v462_v49  ;;  %v507_v55 = vmax.f32 %v505_v37, 0.0  ;;  %v508_v59 = vmax.f32 %v506_v38, 0.0  ;;  %v514_v53 = vmax.f32 %v512_v40, 0.0  ;;  %v515_v54 = vmax.f32 %v513_v41, 0.0 }
 0x2c1   :  { %v521_v56 = vmax.f32 %v519_v42, 0.0  ;;  %v522_v57 = vmax.f32 %v520_v50, 0.0  ;;  %503 = vst [vmem:[#allocation9 + $0x40] sm:$0xff] %v500_v51  ;;  %504 = vst [vmem:[#allocation9 + $0x48] sm:$0xff] %v501_v52 }
 0x2c2   :  { %510 = vst [vmem:[#allocation9 + $0x50] sm:$0xff] %v507_v55  ;;  %511 = vst [vmem:[#allocation9 + $0x58] sm:$0xff] %v508_v59 }
 0x2c3   :  { %517 = vst [vmem:[#allocation9 + $0x60] sm:$0xff] %v514_v53  ;;  %518 = vst [vmem:[#allocation9 + $0x68] sm:$0xff] %v515_v54 }
 0x2c4   :  { %524 = vst [vmem:[#allocation9 + $0x70] sm:$0xff] %v521_v56  ;;  %525 = vst [vmem:[#allocation9 + $0x78] sm:$0xff] %v522_v57 }
 0x2c5   :  { %639 = shalt.err (!%p636_p5)
}
 0x2c6   :  { %537 = dma.vmem_to_hbm [thread:$0]  %s532_s5, 2048, %s765_s3, [#allocation5], %s656_s20, %s656_s20, %s657_s21  }
 0x2c7   :  { %652 = dma.done.wait [#allocation5], 2048  }
 0x2c8   :  { %653 = vsyncadd [#allocation5], 4294965248 }
 0x2c9   :  { %541 = vsyncpa [#allocation4], 1 }
 0x2ca   :  { %542 = vsyncpa [#allocation7], 1 }
 0x2cb   :  { %543 = vsyncpa [#allocation5], 1 }

</bundles_post_ra>
